<compile_context>
chip_gen: v7x
topology: tpu7x:2x2x1
jax: 0.10.0
libtpu: 0.0.40
codegen_flags: <defaults>
</compile_context>

<pallas_src>
import math

import jax
import jax.numpy as jnp
from jax import lax
from jax.experimental import pallas as pl
from jax.experimental.pallas import tpu as pltpu


def _round_up(x, m):
    return (x + m - 1) // m * m


# ----------------------------- fused kernel -----------------------------

def _get_loss_kernel(pred_ref, tgt_ref, e_ref, cls_ref, wlane_ref, trans_ref,
                     parts_ref, reg_ref):
    # ---- weighted-NLL per-lane partial sums for this packed row tile ----
    pred = pred_ref[...].astype(jnp.float32)                 # (tm, W) log-probs
    tgt_f = tgt_ref[...].astype(jnp.float32)                 # (tm, R), -1 on padded rows

    # Expand each row's target across its C adjacent lanes with a tiny one-hot
    # matmul on the MXU:  tgt_exp[m, l] = tgt[m, l // C].
    tgt_exp = jnp.dot(tgt_f, e_ref[...],
                      preferred_element_type=jnp.float32)    # (tm, W)

    mask = tgt_exp == cls_ref[...]                           # (tm, W); cls[l] = l % C
    sel = jnp.where(mask, pred, 0.0)
    col_pred = jnp.sum(sel, axis=0, keepdims=True)           # (1, W)
    col_cnt = jnp.sum(jnp.where(mask, 1.0, 0.0), axis=0, keepdims=True)

    w = wlane_ref[...]                                       # (1, W); w[l] = weight[l % C]
    num_row = -(col_pred * w)                                # per-lane  sum -w[t]*pred[.,t]
    den_row = col_cnt * w                                    # per-lane  sum  w[t]

    sub = lax.broadcasted_iota(jnp.int32, parts_ref.shape[1:], 0)     # (8, W)
    blk = jnp.where(sub == 0, jnp.broadcast_to(num_row, sub.shape),
                    jnp.where(sub == 1, jnp.broadcast_to(den_row, sub.shape), 0.0))
    parts_ref[0] = blk                                       # lane-dense per-step partials

    # keep the regularizer output deterministic on every step
    reg_ref[0] = jnp.zeros(reg_ref.shape[1:], jnp.float32)

    # ---- feature-transform regularizer, once, on the LAST grid step ----
    @pl.when(pl.program_id(0) == pl.num_programs(0) - 1)
    def _reg():
        t = trans_ref[...]                                   # (B, K, K), resident
        m = jnp.einsum('bij,bkj->bik', t, t,
                       preferred_element_type=jnp.float32)   # A @ A^T per batch (MXU)
        r = lax.broadcasted_iota(jnp.int32, m.shape, 1)
        c = lax.broadcasted_iota(jnp.int32, m.shape, 2)
        d = m - jnp.where(r == c, 1.0, 0.0)                  # explicit diagonal subtraction
        fro = jnp.sqrt(jnp.sum(jnp.sum(d * d, axis=2), axis=1, keepdims=True))  # (B, 1)
        reg_ref[0] = jnp.zeros(reg_ref.shape[1:], jnp.float32) + jnp.sum(fro)


# ------------------------------- wrapper --------------------------------

def get_loss(pred, target, trans_feat, weight, mat_diff_loss_scale=0.001,
             tile_bytes=2 * 1024 * 1024):
    """total_loss = F.nll_loss(pred, target, weight) + reg(trans_feat) * scale."""
    N, C = pred.shape
    B, K, _ = trans_feat.shape

    # lane-dense repack: (N, C) -> (n_rows, W) with W = R*C a multiple of 128
    R = 128 // math.gcd(C, 128)
    W = R * C

    itemsize = jnp.dtype(pred.dtype).itemsize
    n_rows_min = _round_up(max(pl.cdiv(N, R), 1), 8)
    tm = max(8, (tile_bytes // (W * itemsize)) // 8 * 8)     # packed rows per grid step
    tm = min(tm, n_rows_min)
    n_rows = _round_up(n_rows_min, tm)
    grid = n_rows // tm
    n_pad = n_rows * R

    tgt = target.reshape(N).astype(jnp.int32)
    pred_in = pred                                            # keep native dtype (bf16 ok)
    if n_pad != N:
        pred_in = jnp.pad(pred_in, ((0, n_pad - N), (0, 0)))
        tgt = jnp.pad(tgt, (0, n_pad - N), constant_values=-1)
    pred_packed = pred_in.reshape(n_rows, W)                  # contiguous reshape -> free
    tgt_packed = tgt.reshape(n_rows, R)

    # tiny resident constants
    lane = jnp.arange(W, dtype=jnp.int32)
    e_mat = (jnp.arange(R, dtype=jnp.int32)[:, None] == (lane // C)[None, :]
             ).astype(jnp.float32)                            # (R, W) one-hot expansion
    cls_row = (lane % C).astype(jnp.float32).reshape(1, W)    # per-lane class index
    wlane = jnp.tile(weight.astype(jnp.float32).reshape(1, C), (1, R))   # (1, W)

    cost = pl.CostEstimate(
        flops=int(2 * n_rows * R * W + 6 * n_rows * W
                  + 2 * B * K * K * K + 4 * B * K * K),
        transcendentals=int(B),
        bytes_accessed=int(pred_packed.size * itemsize + tgt_packed.size * 4
                           + trans_feat.size * jnp.dtype(trans_feat.dtype).itemsize
                           + grid * 8 * (W + 128) * 4),
    )

    parts, regv = pl.pallas_call(
        _get_loss_kernel,
        out_shape=(jax.ShapeDtypeStruct((grid, 8, W), jnp.float32),
                   jax.ShapeDtypeStruct((grid, 8, 128), jnp.float32)),
        grid=(grid,),
        in_specs=[
            pl.BlockSpec((tm, W), lambda i: (i, 0)),          # pred rows (pipelined)
            pl.BlockSpec((tm, R), lambda i: (i, 0)),          # targets (pipelined)
            pl.BlockSpec((R, W), lambda i: (0, 0)),           # one-hot expansion (resident)
            pl.BlockSpec((1, W), lambda i: (0, 0)),           # per-lane class id (resident)
            pl.BlockSpec((1, W), lambda i: (0, 0)),           # per-lane class weight (resident)
            pl.BlockSpec((B, K, K), lambda i: (0, 0, 0)),     # trans_feat (resident)
        ],
        out_specs=(pl.BlockSpec((1, 8, W), lambda i: (i, 0, 0)),
                   pl.BlockSpec((1, 8, 128), lambda i: (i, 0, 0))),
        compiler_params=pltpu.CompilerParams(
            dimension_semantics=("parallel",),                # both TCs on v7x
            vmem_limit_bytes=32 * 1024 * 1024),
        cost_estimate=cost,
    )(pred_packed, tgt_packed, e_mat, cls_row, wlane, trans_feat)

    # PyTorch nll_loss(reduction='mean', weight=w): sum(-w[t_i]*pred[i,t_i]) / sum(w[t_i])
    num = jnp.sum(parts[:, 0, :])
    den = jnp.sum(parts[:, 1, :])
    nll = num / den
    reg_mean = regv[-1, 0, 0] / jnp.float32(B)
    return nll + reg_mean * jnp.asarray(mat_diff_loss_scale, jnp.float32)


# ------------------------------ reference -------------------------------

def _ref_get_loss(pred, target, trans_feat, weight, scale=0.001):
    w_t = weight[target]
    nll = -jnp.sum(w_t * pred[jnp.arange(pred.shape[0]), target]) / jnp.sum(w_t)
    K = trans_feat.shape[1]
    m = jnp.einsum('bij,bkj->bik', trans_feat, trans_feat,
                   precision=lax.Precision.HIGHEST) - jnp.eye(K, dtype=jnp.float32)
    reg = jnp.mean(jnp.sqrt(jnp.sum(m * m, axis=(1, 2))))
    return nll + reg * scale


if __name__ == "__main__":
    key = jax.random.PRNGKey(0)
    k1, k2, k3, k4 = jax.random.split(key, 4)

    # Small shapes; N non-multiple of the packed width to exercise padding, and
    # a tiny tile so the grid has several steps (incl. last-step regularizer).
    N, C = 300, 8         # N = batch*points of per-point predictions, C = classes
    B, K = 2, 64          # feature-transform matrices (PointNet uses K=64)

    logits = jax.random.normal(k1, (N, C), dtype=jnp.float32)
    pred = jax.nn.log_softmax(logits, axis=-1)                # log-probs like PyTorch pred
    target = jax.random.randint(k2, (N,), 0, C, dtype=jnp.int32)
    weight = jax.random.uniform(k3, (C,), dtype=jnp.float32, minval=0.5, maxval=1.5)
    trans_feat = jax.random.normal(k4, (B, K, K), dtype=jnp.float32) * 0.1

    out = get_loss(pred, target, trans_feat, weight, tile_bytes=4096)  # -> 3 grid steps
    out = jax.block_until_ready(out)

    ref = _ref_get_loss(pred, target, trans_feat, weight)
    assert jnp.allclose(out, ref, rtol=1e-5, atol=5e-5), (out, ref)

    print("KERNEL_OK")
</pallas_src>

<mosaic_0001>
module attributes {stable_mosaic.version = 11 : i64} {
  func.func @_get_loss_kernel(%arg0: i32, %arg1: memref<8x128xf32, #tpu.memory_space<vmem>>, %arg2: memref<8x16xi32, #tpu.memory_space<vmem>>, %arg3: memref<16x128xf32, #tpu.memory_space<vmem>>, %arg4: memref<1x128xf32, #tpu.memory_space<vmem>>, %arg5: memref<1x128xf32, #tpu.memory_space<vmem>>, %arg6: memref<2x64x64xf32, #tpu.memory_space<vmem>>, %arg7: memref<1x8x128xf32, #tpu.memory_space<vmem>>, %arg8: memref<1x8x128xf32, #tpu.memory_space<vmem>>) attributes {dimension_semantics = [#tpu.dimension_semantics<parallel>], iteration_bounds = array<i64: 3>, scalar_prefetch = 0 : i64, scratch_operands = 0 : i64, tpu.core_type = #tpu.core_type<tc>, window_params = [{transform_indices = @transform_0, window_bounds = array<i64: 8, 128>}, {transform_indices = @transform_1, window_bounds = array<i64: 8, 16>}, {pipeline_mode = #tpu.pipeline_mode<synchronous>, transform_indices = @transform_2, window_bounds = array<i64: 16, 128>}, {pipeline_mode = #tpu.pipeline_mode<synchronous>, transform_indices = @transform_3, window_bounds = array<i64: 1, 128>}, {pipeline_mode = #tpu.pipeline_mode<synchronous>, transform_indices = @transform_4, window_bounds = array<i64: 1, 128>}, {pipeline_mode = #tpu.pipeline_mode<synchronous>, transform_indices = @transform_5, window_bounds = array<i64: 2, 64, 64>}, {transform_indices = @transform_6, window_bounds = array<i64: 1, 8, 128>}, {transform_indices = @transform_7, window_bounds = array<i64: 1, 8, 128>}]} {
    %c0 = arith.constant 0 : index
    %c0_0 = arith.constant 0 : index
    %0 = vector.load %arg1[%c0, %c0_0] : memref<8x128xf32, #tpu.memory_space<vmem>>, vector<8x128xf32>
    %c0_1 = arith.constant 0 : index
    %c0_2 = arith.constant 0 : index
    %1 = vector.load %arg2[%c0_1, %c0_2] : memref<8x16xi32, #tpu.memory_space<vmem>>, vector<8x16xi32>
    %2 = arith.sitofp %1 : vector<8x16xi32> to vector<8x16xf32>
    %c0_3 = arith.constant 0 : index
    %c0_4 = arith.constant 0 : index
    %3 = vector.load %arg3[%c0_3, %c0_4] : memref<16x128xf32, #tpu.memory_space<vmem>>, vector<16x128xf32>
    %cst = arith.constant dense<0.000000e+00> : vector<8x128xf32>
    %4 = tpu.matmul %2, %3, %cst {dimension_numbers = #tpu.dot_dimension_numbers<[1], [0], [0], [1], [0, 0, 1, 1], [], []>} : vector<8x16xf32>, vector<16x128xf32>, vector<8x128xf32> -> vector<8x128xf32>
    %c0_5 = arith.constant 0 : index
    %c0_6 = arith.constant 0 : index
    %5 = vector.load %arg4[%c0_5, %c0_6] : memref<1x128xf32, #tpu.memory_space<vmem>>, vector<1x128xf32>
    %6 = vector.broadcast %5 : vector<1x128xf32> to vector<8x128xf32>
    %7 = arith.cmpf oeq, %4, %6 : vector<8x128xf32>
    %cst_7 = arith.constant 0.000000e+00 : f32
    %8 = vector.broadcast %cst_7 : f32 to vector<8x128xf32>
    %9 = arith.select %7, %0, %8 : vector<8x128xi1>, vector<8x128xf32>
    %cst_8 = arith.constant dense<0.000000e+00> : vector<128xf32>
    %10 = vector.multi_reduction <add>, %9, %cst_8 [0] : vector<8x128xf32> to vector<128xf32>
    %11 = vector.shape_cast %10 : vector<128xf32> to vector<1x128xf32>
    %cst_9 = arith.constant 1.000000e+00 : f32
    %cst_10 = arith.constant 0.000000e+00 : f32
    %12 = vector.broadcast %cst_9 : f32 to vector<8x128xf32>
    %13 = vector.broadcast %cst_10 : f32 to vector<8x128xf32>
    %14 = arith.select %7, %12, %13 : vector<8x128xi1>, vector<8x128xf32>
    %cst_11 = arith.constant dense<0.000000e+00> : vector<128xf32>
    %15 = vector.multi_reduction <add>, %14, %cst_11 [0] : vector<8x128xf32> to vector<128xf32>
    %16 = vector.shape_cast %15 : vector<128xf32> to vector<1x128xf32>
    %c0_12 = arith.constant 0 : index
    %c0_13 = arith.constant 0 : index
    %17 = vector.load %arg5[%c0_12, %c0_13] : memref<1x128xf32, #tpu.memory_space<vmem>>, vector<1x128xf32>
    %18 = arith.mulf %11, %17 : vector<1x128xf32>
    %cst_14 = arith.constant 0.000000e+00 : f32
    %19 = vector.broadcast %cst_14 : f32 to vector<1x128xf32>
    %20 = arith.subf %19, %18 : vector<1x128xf32>
    %21 = arith.mulf %16, %17 : vector<1x128xf32>
    %22 = tpu.iota {dimensions = array<i32: 0>} : vector<8x128xi32>
    %c0_i32 = arith.constant 0 : i32
    %23 = vector.broadcast %c0_i32 : i32 to vector<8x128xi32>
    %24 = arith.cmpi eq, %22, %23 : vector<8x128xi32>
    %25 = vector.shape_cast %20 : vector<1x128xf32> to vector<1x128xf32>
    %26 = vector.broadcast %25 : vector<1x128xf32> to vector<8x128xf32>
    %c1_i32 = arith.constant 1 : i32
    %27 = vector.broadcast %c1_i32 : i32 to vector<8x128xi32>
    %28 = arith.cmpi eq, %22, %27 : vector<8x128xi32>
    %29 = vector.shape_cast %21 : vector<1x128xf32> to vector<1x128xf32>
    %30 = vector.broadcast %29 : vector<1x128xf32> to vector<8x128xf32>
    %cst_15 = arith.constant 0.000000e+00 : f32
    %31 = vector.broadcast %cst_15 : f32 to vector<8x128xf32>
    %32 = arith.select %28, %30, %31 : vector<8x128xi1>, vector<8x128xf32>
    %33 = arith.select %24, %26, %32 : vector<8x128xi1>, vector<8x128xf32>
    %c0_16 = arith.constant 0 : index
    %c0_17 = arith.constant 0 : index
    %c0_18 = arith.constant 0 : index
    %34 = vector.load %arg7[%c0_16, %c0_17, %c0_18] : memref<1x8x128xf32, #tpu.memory_space<vmem>>, vector<1x8x128xf32>
    %35 = vector.shape_cast %34 : vector<1x8x128xf32> to vector<8x128xf32>
    %36 = vector.shape_cast %33 : vector<8x128xf32> to vector<1x8x128xf32>
    tpu.vector_store %arg7[%c0_16, %c0_17, %c0_18], %36 {strides = array<i32>} : memref<1x8x128xf32, #tpu.memory_space<vmem>>, vector<1x8x128xf32>,
    %cst_19 = arith.constant 0.000000e+00 : f32
    %37 = vector.broadcast %cst_19 : f32 to vector<8x128xf32>
    %c0_20 = arith.constant 0 : index
    %c0_21 = arith.constant 0 : index
    %c0_22 = arith.constant 0 : index
    %38 = vector.load %arg8[%c0_20, %c0_21, %c0_22] : memref<1x8x128xf32, #tpu.memory_space<vmem>>, vector<1x8x128xf32>
    %39 = vector.shape_cast %38 : vector<1x8x128xf32> to vector<8x128xf32>
    %40 = vector.shape_cast %37 : vector<8x128xf32> to vector<1x8x128xf32>
    tpu.vector_store %arg8[%c0_20, %c0_21, %c0_22], %40 {strides = array<i32>} : memref<1x8x128xf32, #tpu.memory_space<vmem>>, vector<1x8x128xf32>,
    %c2_i32 = arith.constant 2 : i32
    %41 = arith.cmpi eq, %arg0, %c2_i32 : i32
    %42 = arith.extui %41 : i1 to i32
    %c0_i32_23 = arith.constant 0 : i32
    %43 = arith.cmpi ne, %42, %c0_i32_23 : i32
    scf.if %43 {
      %c0_24 = arith.constant 0 : index
      %c0_25 = arith.constant 0 : index
      %c0_26 = arith.constant 0 : index
      %44 = vector.load %arg6[%c0_24, %c0_25, %c0_26] : memref<2x64x64xf32, #tpu.memory_space<vmem>>, vector<2x64x64xf32>
      "tpu.trace_start"() <{level = 10 : i32, message = "bij,bkj->bik"}> : () -> ()
      %cst_27 = arith.constant dense<0.000000e+00> : vector<2x64x64xf32>
      %45 = tpu.matmul %44, %44, %cst_27 {dimension_numbers = #tpu.dot_dimension_numbers<[2], [2], [1], [1], [0, 0, 0, 1, 1, 1], [0], [0]>} : vector<2x64x64xf32>, vector<2x64x64xf32>, vector<2x64x64xf32> -> vector<2x64x64xf32>
      "tpu.trace_stop"() : () -> ()
      %46 = tpu.iota {dimensions = array<i32: 1>} : vector<2x64x64xi32>
      %47 = tpu.iota {dimensions = array<i32: 2>} : vector<2x64x64xi32>
      %48 = arith.cmpi eq, %46, %47 : vector<2x64x64xi32>
      %cst_28 = arith.constant 1.000000e+00 : f32
      %cst_29 = arith.constant 0.000000e+00 : f32
      %49 = vector.broadcast %cst_28 : f32 to vector<2x64x64xf32>
      %50 = vector.broadcast %cst_29 : f32 to vector<2x64x64xf32>
      %51 = arith.select %48, %49, %50 : vector<2x64x64xi1>, vector<2x64x64xf32>
      %52 = arith.subf %45, %51 : vector<2x64x64xf32>
      %53 = arith.mulf %52, %52 : vector<2x64x64xf32>
      %cst_30 = arith.constant dense<0.000000e+00> : vector<2x64xf32>
      %54 = vector.multi_reduction <add>, %53, %cst_30 [2] : vector<2x64x64xf32> to vector<2x64xf32>
      %cst_31 = arith.constant dense<0.000000e+00> : vector<2xf32>
      %55 = vector.multi_reduction <add>, %54, %cst_31 [1] : vector<2x64xf32> to vector<2xf32>
      %56 = vector.shape_cast %55 : vector<2xf32> to vector<2x1xf32>
      %57 = math.sqrt %56 : vector<2x1xf32>
      %cst_32 = arith.constant 0.000000e+00 : f32
      %58 = vector.broadcast %cst_32 : f32 to vector<8x128xf32>
      %59 = vector.shape_cast %57 : vector<2x1xf32> to vector<1x2x1xf32>
      %cst_33 = arith.constant dense<0.000000e+00> : vector<1xf32>
      %60 = vector.multi_reduction <add>, %59, %cst_33 [1, 2] : vector<1x2x1xf32> to vector<1xf32>
      %61 = vector.shape_cast %60 : vector<1xf32> to vector<1x1x1xf32>
      %62 = vector.extract %61[0, 0, 0] : f32 from vector<1x1x1xf32>
      %63 = vector.broadcast %62 : f32 to vector<8x128xf32>
      %64 = arith.addf %58, %63 : vector<8x128xf32>
      %c0_34 = arith.constant 0 : index
      %c0_35 = arith.constant 0 : index
      %c0_36 = arith.constant 0 : index
      %65 = vector.load %arg8[%c0_34, %c0_35, %c0_36] : memref<1x8x128xf32, #tpu.memory_space<vmem>>, vector<1x8x128xf32>
      %66 = vector.shape_cast %65 : vector<1x8x128xf32> to vector<8x128xf32>
      %67 = vector.shape_cast %64 : vector<8x128xf32> to vector<1x8x128xf32>
      tpu.vector_store %arg8[%c0_34, %c0_35, %c0_36], %67 {strides = array<i32>} : memref<1x8x128xf32, #tpu.memory_space<vmem>>, vector<1x8x128xf32>,
    } else {
    }
    return
  }
  func.func @transform_0(%arg0: i32) -> (i32, i32) {
    %c0_i32 = arith.constant 0 : i32
    %c0_i32_0 = arith.constant 0 : i32
    return %arg0, %c0_i32 : i32, i32
  }
  func.func @transform_1(%arg0: i32) -> (i32, i32) {
    %c0_i32 = arith.constant 0 : i32
    %c0_i32_0 = arith.constant 0 : i32
    return %arg0, %c0_i32 : i32, i32
  }
  func.func @transform_2(%arg0: i32) -> (i32, i32) {
    %c0_i32 = arith.constant 0 : i32
    %c0_i32_0 = arith.constant 0 : i32
    %c0_i32_1 = arith.constant 0 : i32
    return %c0_i32, %c0_i32_0 : i32, i32
  }
  func.func @transform_3(%arg0: i32) -> (i32, i32) {
    %c0_i32 = arith.constant 0 : i32
    %c0_i32_0 = arith.constant 0 : i32
    %c0_i32_1 = arith.constant 0 : i32
    return %c0_i32, %c0_i32_0 : i32, i32
  }
  func.func @transform_4(%arg0: i32) -> (i32, i32) {
    %c0_i32 = arith.constant 0 : i32
    %c0_i32_0 = arith.constant 0 : i32
    %c0_i32_1 = arith.constant 0 : i32
    return %c0_i32, %c0_i32_0 : i32, i32
  }
  func.func @transform_5(%arg0: i32) -> (i32, i32, i32) {
    %c0_i32 = arith.constant 0 : i32
    %c0_i32_0 = arith.constant 0 : i32
    %c0_i32_1 = arith.constant 0 : i32
    %c0_i32_2 = arith.constant 0 : i32
    return %c0_i32, %c0_i32_0, %c0_i32_1 : i32, i32, i32
  }
  func.func @transform_6(%arg0: i32) -> (i32, i32, i32) {
    %c0_i32 = arith.constant 0 : i32
    %c0_i32_0 = arith.constant 0 : i32
    %c0_i32_1 = arith.constant 0 : i32
    return %arg0, %c0_i32, %c0_i32_0 : i32, i32, i32
  }
  func.func @transform_7(%arg0: i32) -> (i32, i32, i32) {
    %c0_i32 = arith.constant 0 : i32
    %c0_i32_0 = arith.constant 0 : i32
    %c0_i32_1 = arith.constant 0 : i32
    return %arg0, %c0_i32, %c0_i32_0 : i32, i32, i32
  }
}

</mosaic_0001>

<bundles_post_ra>
// kernel: tpu_custom_call.1
= control target key start
LH: loop header
LB: loop body
LE: loop exit
PB: predicated region body
PF: predicated region fallthrough
CT: control target
= control target key end

     0   :  { %s1859_s0 = inlined_call_operand.vmem [shape: f32[24,128], index: 0, kind: input, shape index: {}]   ;;  %s1860_s1 = inlined_call_operand.vmem [shape: s32[24,16], index: 1, kind: input, shape index: {}]   ;;  %s1861_s2 = inlined_call_operand.vmem [shape: f32[16,128], index: 2, kind: input, shape index: {}]   ;;  %s1862_s3 = inlined_call_operand.vmem [shape: f32[1,128], index: 3, kind: input, shape index: {}]   ;;  %s1863_s4 = inlined_call_operand.vmem [shape: f32[1,128], index: 4, kind: input, shape index: {}]   ;;  %s1864_s5 = inlined_call_operand.hbm [shape: f32[2,64,64], index: 5, kind: input, shape index: {}]   ;;  %s1865_s6 = inlined_call_operand.hbm [shape: f32[3,8,128], index: 6, kind: output, shape index: {0}]   ;;  %s1866_s7 = inlined_call_operand.hbm [shape: f32[3,8,128], index: 7, kind: output, shape index: {1}]  }
   0x1   :  { %1870 = sst [smem:[#allocation11_spill]] %s1859_s0 }
   0x2   :  { %13 = vsyncpa [#allocation3], 0 }
   0x3   :  { %14 = vsyncpa [#allocation4], 0 }
   0x4   :  { %16 = vsyncpa [#allocation4 + $0x1], 0 }
   0x5   :  { %17 = vsyncpa [#allocation7], 0 }
   0x6   :  { %19 = vsyncpa [#allocation7 + $0x1], 0  ;;  %s1547_s24 = smov 0   ;;  %s1549_s25 = smov 0  }
   0x7   :  { %s1551_s26 = smov 0   ;;  %s1553_s27 = smov 0  }
   0x8 LB: > { %s1568_s28 = sadd.s32 4294967295, %s1496_s27   ;;  %s1105_s29 = sadd.s32 4294967294, %s1496_s27   ;;  %s1496_s27 = sphi %s1553_s27, %s1886_s27   ;;  %s1492_s26 = sphi %s1551_s26, %s1885_s26   ;;  %s1488_s25 = sphi %s1549_s25, %s1884_s25   ;;  %s1484_s24 = sphi %s1547_s24, %s1883_s24  }
   0x9   : > { %s1572_s30 = sadd.s32 1, %s1496_s27   ;;  %s168_s8 = sadd.s32 1, %s1492_s26 }
   0xa   : > { %s165_s9 = ssub.s32 %s1496_s27, %s1572_s30  ;;  %p178_p0 = scmp.ne.s32.totalorder %s1492_s26, %s1488_s25 }
   0xb   : > { %p166_p1 = scmp.eq.s32.totalorder %s165_s9, 0  ;;  %p179_p2 = scmp.eq.s32.totalorder %s1568_s28, 2 }
   0xc   : > { %p184_p3 = scmp.ne.s32.totalorder %s1488_s25, %s1484_s24  ;;  %p185_p4 = scmp.eq.s32.totalorder %s1105_s29, 2 }
   0xd   : > { %s1583_s10 = scalar_select %p166_p1, %s1492_s26, %s168_s8  }
   0xe   : > { %p1585_p5 = por %p179_p2, %p178_p0  ;;  %p1589_p6 = por %p185_p4, %p184_p3 }
   0xf   : > { %p1106_p7 = scmp.ge.s32.totalorder %s1496_s27, 1  ;;  %p218_p8 = scmp.lt.s32.totalorder %s1496_s27, 4 }
  0x10   : > { %s1871_s11 = scalar_select %p1585_p5, 1, 0 }
  0x11   : > { %s1872_s12 = scalar_select %p1589_p6, 1, 0 }
  0x12   : > { %p1867_p9 = scmp.eq.s32.totalorder %s1568_s28, 0  ;;  %p1596_p10 = pnand %p1106_p7, %p218_p8 }
  0x13   : > { %s1498_s14 = smov [#allocation2]   ;;  %s1370_s19 = scalar_lea.hbm %s1864_s5, 2048 }
  0x14   : > { %s1873_s13 = scalar_select %p1596_p10, 1, 0 }
  0x15   : > { %s239_s15 = sshll.u32 %s1498_s14, 4  ;;  %p1315_p11 = pneg %p1596_p10  ;;  %s240_s15 = int_to_ptr.vmem [resolvable:$true] %s239_s15 }
  0x16   : > { %p1371_p13 = scmp.ne.s32.totalorder %s1864_s5, %s1370_s19  ;;  %p1377_p3 = scmp.lt.u32.totalorder %s1370_s19, %s1864_s5 }
  0x17   : > { %p1604_p12 = pnand %p1867_p9, %p1315_p11 }
  0x19   : > { %p1372_p0 = pneg %p1604_p12 }
  0x1b   : > { %p1373_p1 = pnand %p1372_p0, %p1371_p13 }
  0x1d   : > { %p1374_p2 = pneg %p1373_p1 }
  0x1f   : > { %p1379_p4 = pnand %p1377_p3, %p1374_p2 }
  0x21   : > { %1382 = shalt.err (!%p1379_p4)
}
  0x22   : > { %s1383_s29 = scalar_lea.vmem %s240_s15, 2048  ;;  %p1391_p9 = scmp.lt.s32.totalorder %s240_s15, %s240_s15 }
  0x23   : > { %p1384_p7 = scmp.ne.s32.totalorder %s240_s15, %s1383_s29  ;;  %p1392_p6 = scmp.lt.s32.totalorder %s1383_s29, %s1383_s29 }
  0x25   : > { %p1386_p8 = pnand %p1384_p7, %p1372_p0  ;;  %p1393_p5 = por %p1392_p6, %p1391_p9 }
  0x27   : > { %p1387_p11 = pneg %p1386_p8 }
  0x29   : > { %p1394_p10 = pnand %p1393_p5, %p1387_p11 }
  0x2b   : > { %1397 = shalt.err (!%p1394_p10)
}
  0x2c   : > { %s1499_s8 = smov 128   ;;  %s1500_s9 = smov 8  }
  0x2d   : > { %1318 = dma.hbm_to_vmem [thread:$0]  (!%p1604_p12), %s1864_s5, 2048, %s240_s15, [#allocation3], %s1499_s8, %s1499_s8, %s1500_s9  }
  0x2e   : > { %p1875_p13 = scmp.ne.s32.totalorder %s1873_s13, 0 }
  0x2f   : > { %p1876_p1 = scmp.eq.s32.totalorder (!%p1875_p13), %s1568_s28, 0 }
  0x30   : > { %269 = sbr.rel (%p1875_p13) target bundleno = 1083 (0x43b), region = 44 }
  0x37   : > { %1471 = dma.done.wait (%p1876_p1), [#allocation3], 2048   ;;  %p1877_p0 = pmov %p1876_p1 }
  0x38   : > { %s1631_s18 = sand.u32 1, %s1488_s25   ;;  %v1501_v0 = vmov 0.0|0.0   ;;  %vm1502_vm0 = vmmov 0   ;;  %v1503_v1 = vmov 0.0   ;;  %p309_p5 = scmp.lt.s32.totalorder %s1568_s28, 2  ;;  %v320_v2 = vld [vmem:[%s1861_s2] sm:$0xff]  ;;  %v422_v17 = vlaneseq }
  0x39   : > { %1473 = vsyncadd (%p1877_p0), [#allocation3], 4294965248  ;;  %1254 = vmatprep.subr.bf16.mxu0 %v1501_v0  ;;  %s1111_s16 = sshll.u32 %s1631_s18, 3  ;;  %1195 = vmatprep.mubr.msk.f32.mxu0 %vm1502_vm0, %v1503_v1  ;;  %v321_v3 = vld [vmem:[%s1861_s2 + $0x8] sm:$0xff]  ;;  %vm322_vm1 = vcmask 130048   ;;  %s1878_s0 = sld [smem:[#allocation11_spill]] }
  0x3a   : > { %s1637_s13 = scalar_lea.vmem [#allocation6], %s1111_s16  ;;  %v1255_v5 = vpack.c.bf16 %v321_v3, %v320_v2  ;;  %v1116_v7 = vld [vmem:[%s1862_s3] ss:$0 sm:$0xff]  ;;  %v1657_v22 = vshrl.u32 %v422_v17, 7  ;;  %s1667_s23 = scalar_lea.vmem [#allocation5], %s1111_s16 }
  0x3b   : > { %437 = vst [vmem:[%s1637_s13] sm:$0xff] %v1503_v1  ;;  %s310_s15 = scalar_select %p309_p5, %s1568_s28, 2  ;;  %v418_v25 = vld [vmem:[%s1863_s4] sm:$0x1] }
  0x3c   : > { %1256 = vmatpush3.bf16.msra.mxu0 %v1255_v5  ;;  %v427_v28 = vsub.s32 0, %v1657_v22  ;;  %vm429_vm3 = vcmp.eq.s32.totalorder %v1657_v22, 1  ;;  %vm424_vm4 = vcmp.eq.s32.totalorder %v1657_v22, 0  ;;  %p1117_p6 = scmp.ne.s32.totalorder %s1568_s28, 2 }
  0x3d   : > { %s1113_s19 = sshll.u32 %s310_s15, 3  ;;  %v442_v36 = vld [vmem:[#allocation2] sm:$0xff] (!%p1117_p6)  ;;  %v443_v37 = vld [vmem:[#allocation2 + $0x8] sm:$0xff] (!%p1117_p6)  ;;  %vm458_vm5 = vcmask (!%p1117_p6), 523264   ;;  %v444_v42 = vld [vmem:[#allocation2 + $0x10] sm:$0xff] (!%p1117_p6)  ;;  %v717_v61 = vadd.s32 (!%p1117_p6), 8, %v1657_v22 }
  0x3e   : > { %s316_s22 = scalar_lea.vmem %s1860_s1, %s1113_s19  ;;  %v450_v38 = vld [vmem:[#allocation2 + $0x40] sm:$0xff] (!%p1117_p6)  ;;  %v1257_v39 = vpack.c.bf16 (!%p1117_p6), %v443_v37, %v442_v36  ;;  %vm1673_vm6 = vmpackc.low (!%p1117_p6), %vm458_vm5, %vm458_vm5  ;;  %v451_v41 = vld [vmem:[#allocation2 + $0x48] sm:$0xff] (!%p1117_p6)  ;;  %v1727_v62 = vand.u32 (!%p1117_p6), 127, %v422_v17  ;;  %v719_v63 = vadd.s32 (!%p1117_p6), 24, %v1657_v22  ;;  %v1504_v0 = vmov (!%p1117_p6), 0.0  }
  0x3f   : > { %v318_v4 = vld [vmem:[%s316_s22] sm:$0xff]  ;;  %s312_s15 = scalar_lea.vmem %s1878_s0, %s1113_s19  ;;  %1242 = vmatprep.mubr.msk.f32.mxu1 (!%p1117_p6), %vm458_vm5, %v450_v38  ;;  %v1281_v43 = vpack.c.bf16 (!%p1117_p6), %v451_v41, %v450_v38  ;;  %v445_v44 = vld [vmem:[#allocation2 + $0x18] sm:$0xff] (!%p1117_p6)  ;;  %v452_v45 = vld [vmem:[#allocation2 + $0x50] sm:$0xff] (!%p1117_p6)  ;;  %v718_v3 = vadd.s32 (!%p1117_p6), 16, %v1657_v22  ;;  %vm847_vm15 = vcmask (!%p1117_p6), 130112   ;;  %vm854_vm0 = vcmask (!%p1117_p6), 195712  }
  0x40   : > { %v319_v6 = vcvt.s32.f32 %v318_v4  ;;  %v317_v8 = vld [vmem:[%s312_s15] sm:$0xff]  ;;  %v453_v46 = vld [vmem:[#allocation2 + $0x58] sm:$0xff] (!%p1117_p6)  ;;  %1259 = vmatprep.subr.msk.bf16.mxu0 (!%p1117_p6), %vm1673_vm6, %v1257_v39  ;;  %v1263_v47 = vpack.c.bf16 (!%p1117_p6), %v445_v44, %v444_v42  ;;  %v447_v50 = vld [vmem:[#allocation2 + $0x28] sm:$0xff] (!%p1117_p6)  ;;  %vm727_vm7 = vcmp.eq.s32.totalorder (!%p1117_p6), %v717_v61, %v1727_v62  ;;  %vm726_vm8 = vcmp.eq.s32.totalorder (!%p1117_p6), %v1657_v22, %v1727_v62 }
  0x41   : > { %v1287_v48 = vpack.c.bf16 (!%p1117_p6), %v453_v46, %v452_v45  ;;  %1283 = vmatprep.subr.msk.bf16.mxu1 (!%p1117_p6), %vm1673_vm6, %v1281_v43  ;;  %v446_v49 = vld [vmem:[#allocation2 + $0x20] sm:$0xff] (!%p1117_p6)  ;;  %v455_v52 = vld [vmem:[#allocation2 + $0x68] sm:$0xff] (!%p1117_p6)  ;;  %v448_v55 = vld [vmem:[#allocation2 + $0x30] sm:$0xff] (!%p1117_p6)  ;;  %v734_v2 = vsel (!%p1117_p6), %vm726_vm8, 1.0, %v1504_v0  ;;  %vm729_vm9 = vcmp.eq.s32.totalorder (!%p1117_p6), %v719_v63, %v1727_v62  ;;  %vm728_vm10 = vcmp.eq.s32.totalorder (!%p1117_p6), %v718_v3, %v1727_v62 }
  0x42   : > { %1196 = vmatmul.mubr.msk.f32.vlgmr.msra.gmra.mrb[0].mxu0 %vm322_vm1, %v319_v6  ;;  %1286 = vmatpush3.bf16.xpose.msk.msra.mxu1 (!%p1117_p6), %vm1673_vm6, %v1281_v43  ;;  %v454_v51 = vld [vmem:[#allocation2 + $0x60] sm:$0xff] (!%p1117_p6)  ;;  %v1269_v53 = vpack.c.bf16 (!%p1117_p6), %v447_v50, %v446_v49  ;;  %v449_v56 = vld [vmem:[#allocation2 + $0x38] sm:$0xff] (!%p1117_p6)  ;;  %v456_v57 = vld [vmem:[#allocation2 + $0x70] sm:$0xff] (!%p1117_p6)  ;;  %vm861_vm1 = vcmask (!%p1117_p6), 261312  }
  0x43   : > { %1214 = vmatprep.mubr.msk.f32.mxu0 (!%p1117_p6), %vm458_vm5, %v442_v36  ;;  %1289 = vmatprep.subr.msk.bf16.mxu1 (!%p1117_p6), %vm1673_vm6, %v1287_v48  ;;  %v1293_v54 = vpack.c.bf16 (!%p1117_p6), %v455_v52, %v454_v51  ;;  %v457_v58 = vld [vmem:[#allocation2 + $0x78] sm:$0xff] (!%p1117_p6)  ;;  %v1275_v59 = vpack.c.bf16 (!%p1117_p6), %v449_v56, %v448_v55 }
  0x44   : > { %v1299_v60 = vpack.c.bf16 (!%p1117_p6), %v457_v58, %v456_v57 }
  0x45   : > { %1262 = vmatpush3.bf16.xpose.msk.msra.mxu0 (!%p1117_p6), %vm1673_vm6, %v1257_v39 }
  0x46   : > { %1265 = vmatprep.subr.msk.bf16.mxu0 (!%p1117_p6), %vm1673_vm6, %v1263_v47 }
  0x4a   : > { %1292 = vmatpush3.bf16.xpose.msk.msra.mxu1 (!%p1117_p6), %vm1673_vm6, %v1287_v48 }
  0x4b   : > { %1295 = vmatprep.subr.msk.bf16.mxu1 (!%p1117_p6), %vm1673_vm6, %v1293_v54 }
  0x4d   : > { %1268 = vmatpush3.bf16.xpose.msk.msra.mxu0 (!%p1117_p6), %vm1673_vm6, %v1263_v47 }
  0x4e   : > { %1271 = vmatprep.subr.msk.bf16.mxu0 (!%p1117_p6), %vm1673_vm6, %v1269_v53 }
  0x52   : > { %1298 = vmatpush3.bf16.xpose.msk.msra.mxu1 (!%p1117_p6), %vm1673_vm6, %v1293_v54 }
  0x53   : > { %1301 = vmatprep.subr.msk.bf16.mxu1 (!%p1117_p6), %vm1673_vm6, %v1299_v60 }
  0x55   : > { %1274 = vmatpush3.bf16.xpose.msk.msra.mxu0 (!%p1117_p6), %vm1673_vm6, %v1269_v53  ;;  %v723_v53 = vadd.s32 (!%p1117_p6), 56, %v1657_v22 }
  0x56   : > { %1277 = vmatprep.subr.msk.bf16.mxu0 (!%p1117_p6), %vm1673_vm6, %v1275_v59 }
  0x57   : > { %vm733_vm14 = vcmp.eq.s32.totalorder (!%p1117_p6), %v723_v53, %v1727_v62 }
  0x5a   : > { %1304 = vmatpush3.bf16.xpose.msk.msra.mxu1 (!%p1117_p6), %vm1673_vm6, %v1299_v60 }
  0x5d   : > { %1280 = vmatpush3.bf16.xpose.msk.msra.mxu0 (!%p1117_p6), %vm1673_vm6, %v1275_v59  ;;  %vm930_vm6 = vcmask (!%p1117_p6), 1041409  }
  0x61   : > { %1243 = vmatmul.mubr.msk.f32.vlgmr.msra.gmra.mrb[0].mxu1 (!%p1117_p6), %vm458_vm5, %v451_v41 }
  0x62   : > { %1245 = vmatprep.mubr.msk.f32.mxu1 (!%p1117_p6), %vm458_vm5, %v452_v45 }
  0x65   : > { %1246 = vmatmul.mubr.msk.f32.gmra.mrb[2].mxu1 (!%p1117_p6), %vm458_vm5, %v453_v46 }
  0x66   : > { %1248 = vmatprep.mubr.msk.f32.mxu1 (!%p1117_p6), %vm458_vm5, %v454_v51 }
  0x69   : > { %1249 = vmatmul.mubr.msk.f32.gmra.mrb[4].mxu1 (!%p1117_p6), %vm458_vm5, %v455_v52 }
  0x6a   : > { %1251 = vmatprep.mubr.msk.f32.mxu1 (!%p1117_p6), %vm458_vm5, %v456_v57 }
  0x6d   : > { %1252 = vmatmul.mubr.msk.f32.gmra.mrb[6].mxu1 (!%p1117_p6), %vm458_vm5, %v457_v58 }
 0x115   : > { %v392_v9 = vpop.f32.mrb[0].mxu0 }
 0x116   : > { %vm403_vm2 = vcmp.eq.f32.partialorder %v392_v9, %v1116_v7  ;;  %v1197_v10 = vpop.f32.mrb[1].mxu0  ;;  %1215 = vmatmul.mubr.msk.f32.vlgmr.msra.gmra.mrb[0].mxu0 (!%p1117_p6), %vm458_vm5, %v443_v37  ;;  %v722_v37 = vadd.s32 (!%p1117_p6), 48, %v1657_v22 }
 0x117   : > { %v404_v11 = vsel %vm403_vm2, %v317_v8, 0.0  ;;  %v411_v12 = vsel %vm403_vm2, 1.0, %v1503_v1  ;;  %1217 = vmatprep.mubr.msk.f32.mxu0 (!%p1117_p6), %vm458_vm5, %v444_v42  ;;  %v735_v1 = vsel (!%p1117_p6), %vm727_vm7, 1.0, %v1504_v0  ;;  %v721_v8 = vadd.s32 (!%p1117_p6), 40, %v1657_v22 }
 0x118   : > { %v405_v13 = vrot.slane %v404_v11, 4  ;;  %v412_v14 = vrot.slane %v411_v12, 4  ;;  %vm732_vm13 = vcmp.eq.s32.totalorder (!%p1117_p6), %v722_v37, %v1727_v62  ;;  %vm868_vm2 = vcmask (!%p1117_p6), 326912  }
 0x119   : > { %vm731_vm11 = vcmp.eq.s32.totalorder (!%p1117_p6), %v721_v8, %v1727_v62  ;;  %vm933_vm7 = vcmask (!%p1117_p6), 517120  }
 0x11a   : > { %v406_v15 = vadd.f32 %v405_v13, %v404_v11  ;;  %v413_v16 = vadd.f32 %v412_v14, %v411_v12  ;;  %1218 = vmatmul.mubr.msk.f32.gmra.mrb[2].mxu0 (!%p1117_p6), %vm458_vm5, %v445_v44  ;;  %v737_v12 = vsel (!%p1117_p6), %vm729_vm9, 1.0, %v1504_v0  ;;  %vm944_vm9 = vcmask (!%p1117_p6), 1024  }
 0x11b   : > { %1220 = vmatprep.mubr.msk.f32.mxu0 (!%p1117_p6), %vm458_vm5, %v446_v49 }
 0x11c   : > { %v407_v18 = vrot.slane %v406_v15, 2  ;;  %v414_v19 = vrot.slane %v413_v16, 2 }
 0x11e   : > { %v408_v20 = vadd.f32 %v407_v18, %v406_v15  ;;  %v415_v21 = vadd.f32 %v414_v19, %v413_v16  ;;  %1221 = vmatmul.mubr.msk.f32.gmra.mrb[4].mxu0 (!%p1117_p6), %vm458_vm5, %v447_v50 }
 0x11f   : > { %1223 = vmatprep.mubr.msk.f32.mxu0 (!%p1117_p6), %vm458_vm5, %v448_v55  ;;  %v740_v55 = vsel (!%p1117_p6), %vm732_vm13, 1.0, %v1504_v0 }
 0x120   : > { %v409_v23 = vrot.slane %v408_v20, 1  ;;  %v416_v24 = vrot.slane %v415_v21, 1 }
 0x122   : > { %v410_v26 = vadd.f32 %v409_v23, %v408_v20  ;;  %v417_v27 = vadd.f32 %v416_v24, %v415_v21  ;;  %1224 = vmatmul.mubr.msk.f32.gmra.mrb[6].mxu0 (!%p1117_p6), %vm458_vm5, %v449_v56 }
 0x124   : > { %v419_v29 = vmul.f32 %v418_v25, %v410_v26  ;;  %v421_v30 = vmul.f32 %v418_v25, %v417_v27  ;;  %v736_v26 = vsel (!%p1117_p6), %vm728_vm10, 1.0, %v1504_v0 }
 0x125   : > { %441 = sbr.rel (%p1117_p6) target bundleno = 1034 (0x40a), region = 52 }
 0x126   : > { %v420_v31 = vsub.f32 0.0, %v419_v29  ;;  %v433_v32 = vrot.slane %v421_v30, %v427_v28  ;;  %v720_v29 = vadd.s32 (!%p1117_p6), 32, %v1657_v22 }
 0x128   : > { %v428_v33 = vrot.slane %v420_v31, %v427_v28  ;;  %v434_v34 = vsel %vm429_vm3, %v433_v32, 0.0  ;;  %v739_v32 = vsel (!%p1117_p6), %vm731_vm11, 1.0, %v1504_v0  ;;  %vm730_vm12 = vcmp.eq.s32.totalorder (!%p1117_p6), %v720_v29, %v1727_v62 }
 0x129   : > { %v738_v50 = vsel (!%p1117_p6), %vm730_vm12, 1.0, %v1504_v0  ;;  %v863_v29 = vadd.s32 (!%p1117_p6), 4294967264, %v1727_v62  ;;  %vm875_vm3 = vcmask (!%p1117_p6), 392512  }
 0x12a   : > { %v435_v35 = vsel %vm424_vm4, %v428_v33, %v434_v34  ;;  %vm882_vm4 = vcmask (!%p1117_p6), 458112  }
 0x12b   : > { %436 = vst [vmem:[%s1667_s23] sm:$0xff] %v435_v35 }
 0x134   : > { %v1244_v6 = vpop.f32.mrb[0].mxu1 }
 0x135   : > { %v751_v9 = vsub.f32 %v1244_v6, %v735_v1  ;;  %v678_v11 = vpop.f32.mrb[1].mxu1 }
 0x136   : > { %v750_v14 = vsub.f32 %v678_v11, %v734_v2 }
 0x137   : > { %v767_v15 = vmul.f32 %v751_v9, %v751_v9 }
 0x138   : > { %v1247_v20 = vpop.f32.mrb[2].mxu1  ;;  %v766_v23 = vmul.f32 %v750_v14, %v750_v14 }
 0x139   : > { %v801_v24 = vsel %vm458_vm5, %v767_v15, 0.0  ;;  %v753_v25 = vsub.f32 %v1247_v20, %v737_v12  ;;  %v688_v27 = vpop.f32.mrb[3].mxu1 }
 0x13a   : > { %802 = vadd.xlane.f32.xlu1 %v801_v24  ;;  %v752_v38 = vsub.f32 %v688_v27, %v736_v26  ;;  %v798_v39 = vsel %vm458_vm5, %v766_v23, 0.0  ;;  %v849_v23 = vadd.s32 4294967280, %v1727_v62  ;;  %v842_v24 = vadd.s32 4294967288, %v1727_v62 }
 0x13b   : > { %v769_v30 = vmul.f32 %v753_v25, %v753_v25 }
 0x13c   : > { %v1250_v35 = vpop.f32.mrb[4].mxu1  ;;  %v768_v49 = vmul.f32 %v752_v38, %v752_v38  ;;  %v866_v38 = vsub.s32 %v863_v29, %v1657_v22 }
 0x13d   : > { %v698_v40 = vpop.f32.mrb[5].mxu1  ;;  %v807_v43 = vsel %vm458_vm5, %v769_v30, 0.0  ;;  %v755_v44 = vsub.f32 %v1250_v35, %v739_v32  ;;  %v845_v30 = vsub.s32 %v842_v24, %v1657_v22 }
 0x13e   : > { %799 = vadd.xlane.f32.xlu1 %v798_v39  ;;  %v754_v58 = vsub.f32 %v698_v40, %v738_v50  ;;  %v804_v59 = vsel %vm458_vm5, %v768_v49, 0.0  ;;  %v877_v39 = vadd.s32 4294967248, %v1727_v62 }
 0x13f   : > { %v771_v54 = vmul.f32 %v755_v44, %v755_v44 }
 0x140   : > { %v1253_v47 = vpop.f32.mrb[6].mxu1  ;;  %v770_v3 = vmul.f32 %v754_v58, %v754_v58 }
 0x141   : > { %v708_v51 = vpop.f32.mrb[7].mxu1  ;;  %v813_v63 = vsel %vm458_vm5, %v771_v54, 0.0 }
 0x142   : > { %808 = vadd.xlane.f32.xlu1 %v807_v43 }
 0x146   : > { %805 = vadd.xlane.f32.xlu1 %v804_v59 }
 0x14a   : > { %814 = vadd.xlane.f32.xlu1 %v813_v63 }
 0x1e9   : > { %v1216_v4 = vpop.f32.mrb[0].mxu0 }
 0x1ea   : > { %v743_v5 = vsub.f32 %v1216_v4, %v735_v1  ;;  %v549_v7 = vpop.f32.mrb[1].mxu0  ;;  %v756_v1 = vsub.f32 %v708_v51, %v740_v55  ;;  %v741_v4 = vsel %vm733_vm14, 1.0, %v1504_v0 }
 0x1eb   : > { %v742_v10 = vsub.f32 %v549_v7, %v734_v2  ;;  %v757_v9 = vsub.f32 %v1253_v47, %v741_v4 }
 0x1ec   : > { %v759_v13 = vmul.f32 %v743_v5, %v743_v5  ;;  %v772_v6 = vmul.f32 %v756_v1, %v756_v1 }
 0x1ed   : > { %v1219_v16 = vpop.f32.mrb[2].mxu0  ;;  %v758_v17 = vmul.f32 %v742_v10, %v742_v10  ;;  %v810_v10 = vsel %vm458_vm5, %v770_v3, 0.0  ;;  %v773_v14 = vmul.f32 %v757_v9, %v757_v9 }
 0x1ee   : > { %v777_v18 = vsel %vm458_vm5, %v759_v13, 0.0  ;;  %v745_v19 = vsub.f32 %v1219_v16, %v737_v12  ;;  %v559_v21 = vpop.f32.mrb[3].mxu0  ;;  %811 = vadd.xlane.f32.xlu1 %v810_v10  ;;  %v816_v12 = vsel %vm458_vm5, %v772_v6, 0.0 }
 0x1ef   : > { %778 = vadd.xlane.f32.xlu0 %v777_v18  ;;  %v744_v33 = vsub.f32 %v559_v21, %v736_v26  ;;  %v774_v34 = vsel %vm458_vm5, %v758_v17, 0.0  ;;  %v819_v15 = vsel %vm458_vm5, %v773_v14, 0.0  ;;  %v803_v17 = vpop.xlane.xlu1 %802  ;;  %v840_v26 = vsub.s32 %v1727_v62, %v1657_v22 }
 0x1f0   : > { %v761_v28 = vmul.f32 %v745_v19, %v745_v19  ;;  %v898_v43 = vrot.slane %v803_v17, %v845_v30 }
 0x1f1   : > { %v1222_v31 = vpop.f32.mrb[4].mxu0  ;;  %v760_v46 = vmul.f32 %v744_v33, %v744_v33 }
 0x1f2   : > { %v569_v36 = vpop.f32.mrb[5].mxu0  ;;  %v783_v41 = vsel %vm458_vm5, %v761_v28, 0.0  ;;  %v747_v42 = vsub.f32 %v1222_v31, %v739_v32  ;;  %817 = vadd.xlane.f32.xlu1 %v816_v12  ;;  %v852_v28 = vsub.s32 %v849_v23, %v1657_v22  ;;  %v856_v31 = vadd.s32 4294967272, %v1727_v62 }
 0x1f3   : > { %775 = vadd.xlane.f32.xlu0 %v774_v34  ;;  %v746_v56 = vsub.f32 %v569_v36, %v738_v50  ;;  %v780_v57 = vsel %vm458_vm5, %v760_v46, 0.0  ;;  %v800_v19 = vpop.xlane.xlu1 %799  ;;  %v870_v34 = vadd.s32 4294967256, %v1727_v62 }
 0x1f4   : > { %v763_v52 = vmul.f32 %v747_v42, %v747_v42  ;;  %v894_v36 = vrot.slane %v800_v19, %v840_v26 }
 0x1f5   : > { %v1225_v45 = vpop.f32.mrb[6].mxu0  ;;  %v762_v2 = vmul.f32 %v746_v56, %v746_v56  ;;  %v873_v46 = vsub.s32 %v870_v34, %v1657_v22 }
 0x1f6   : > { %v579_v48 = vpop.f32.mrb[7].mxu0  ;;  %v789_v60 = vsel %vm458_vm5, %v763_v52, 0.0  ;;  %v749_v7 = vsub.f32 %v1225_v45, %v741_v4  ;;  %820 = vadd.xlane.f32.xlu1 %v819_v15  ;;  %v899_v49 = vsel %vm847_vm15, %v898_v43, %v894_v36  ;;  %v880_v52 = vsub.s32 %v877_v39, %v1657_v22 }
 0x1f7   : > { %784 = vadd.xlane.f32.xlu0 %v783_v41  ;;  %v748_v61 = vsub.f32 %v579_v48, %v740_v55  ;;  %v786_v8 = vsel %vm458_vm5, %v762_v2, 0.0  ;;  %v809_v21 = vpop.xlane.xlu1 %808  ;;  %v859_v41 = vsub.s32 %v856_v31, %v1657_v22  ;;  %v884_v48 = vadd.s32 4294967240, %v1727_v62 }
 0x1f8   : > { %v765_v13 = vmul.f32 %v749_v7, %v749_v7 }
 0x1f9   : > { %v764_v5 = vmul.f32 %v748_v61, %v748_v61  ;;  %v908_v56 = vrot.slane %v809_v21, %v859_v41 }
 0x1fa   : > { %v795_v0 = vsel %vm458_vm5, %v765_v13, 0.0 }
 0x1fb   : > { %781 = vadd.xlane.f32.xlu0 %v780_v57  ;;  %v792_v11 = vsel %vm458_vm5, %v764_v5, 0.0  ;;  %v806_v27 = vpop.xlane.xlu1 %805  ;;  %vm889_vm5 = vcmask 523712  }
 0x1fc   : > { %v903_v42 = vrot.slane %v806_v27, %v852_v28 }
 0x1fe   : > { %v904_v54 = vsel %vm854_vm0, %v903_v42, %v899_v49 }
 0x1ff   : > { %790 = vadd.xlane.f32.xlu0 %v789_v60  ;;  %v815_v35 = vpop.xlane.xlu1 %814  ;;  %v887_v60 = vsub.s32 %v884_v48, %v1657_v22  ;;  %v909_v61 = vsel %vm861_vm1, %v908_v56, %v904_v54 }
 0x200   : > { %v918_v4 = vrot.slane %v815_v35, %v873_v46 }
 0x203   : > { %787 = vadd.xlane.f32.xlu0 %v786_v8 }
 0x207   : > { %793 = vadd.xlane.f32.xlu0 %v792_v11 }
 0x20b   : > { %796 = vadd.xlane.f32.xlu0 %v795_v0 }
 0x27b   : > { %v812_v47 = vpop.xlane.xlu1 %811 }
 0x27c   : > { %v779_v16 = vpop.xlane.xlu0 %778  ;;  %v913_v55 = vrot.slane %v812_v47, %v866_v38 }
 0x27d   : > { %v846_v40 = vrot.slane %v779_v16, %v845_v30 }
 0x27e   : > { %v914_v2 = vsel %vm868_vm2, %v913_v55, %v909_v61 }
 0x27f   : > { %v818_v59 = vpop.xlane.xlu1 %817  ;;  %v919_v9 = vsel %vm875_vm3, %v918_v4, %v914_v2 }
 0x280   : > { %v776_v18 = vpop.xlane.xlu0 %775  ;;  %v923_v3 = vrot.slane %v818_v59, %v880_v52 }
 0x281   : > { %v841_v33 = vrot.slane %v776_v18, %v840_v26 }
 0x282   : > { %v924_v22 = vsel %vm882_vm4, %v923_v3, %v919_v9 }
 0x283   : > { %v848_v45 = vsel %vm847_vm15, %v846_v40, %v841_v33  ;;  %v821_v7 = vpop.xlane.xlu1 %820 }
 0x284   : > { %v785_v20 = vpop.xlane.xlu0 %784  ;;  %v928_v11 = vrot.slane %v821_v7, %v887_v60 }
 0x285   : > { %v860_v53 = vrot.slane %v785_v20, %v859_v41 }
 0x286   : > { %v929_v13 = vsel %vm889_vm5, %v928_v11, %v924_v22 }
 0x288   : > { %v782_v25 = vpop.xlane.xlu0 %781 }
 0x289   : > { %v853_v37 = vrot.slane %v782_v25, %v852_v28 }
 0x28b   : > { %v855_v50 = vsel %vm854_vm0, %v853_v37, %v848_v45 }
 0x28c   : > { %v791_v32 = vpop.xlane.xlu0 %790  ;;  %v862_v58 = vsel %vm861_vm1, %v860_v53, %v855_v50 }
 0x28d   : > { %v874_v1 = vrot.slane %v791_v32, %v873_v46 }
 0x290   : > { %v788_v44 = vpop.xlane.xlu0 %787 }
 0x291   : > { %v867_v51 = vrot.slane %v788_v44, %v866_v38 }
 0x293   : > { %v869_v62 = vsel %vm868_vm2, %v867_v51, %v862_v58 }
 0x294   : > { %v794_v57 = vpop.xlane.xlu0 %793  ;;  %v876_v6 = vsel %vm875_vm3, %v874_v1, %v869_v62 }
 0x295   : > { %v881_v63 = vrot.slane %v794_v57, %v880_v52 }
 0x297   : > { %v883_v10 = vsel %vm882_vm4, %v881_v63, %v876_v6 }
 0x298   : > { %v797_v5 = vpop.xlane.xlu0 %796 }
 0x299   : > { %v888_v8 = vrot.slane %v797_v5, %v887_v60 }
 0x29b   : > { %v890_v12 = vsel %vm889_vm5, %v888_v8, %v883_v10 }
 0x29c   : > { %v931_v14 = vsel %vm930_vm6, %v929_v13, %v890_v12 }
 0x29d   : > { %v934_v0 = vsel %vm933_vm7, %v931_v14, 0.0 }
 0x29e   : > { %935 = vadd.xlane.f32.xlu0 %v934_v0 }
 0x32b   : > { %v936_v15 = vpop.xlane.xlu0 %935 }
 0x32c   : > { %1368 = vrsqrt.f32 %v936_v15  ;;  %vm939_vm8 = vcmp.eq.f32.partialorder %v936_v15, inf  ;;  %v942_v18 = vand.u32 2147483648, %v936_v15  ;;  %vm941_vm10 = vcmp.eq.f32.partialorder %v936_v15, 0.0 }
 0x336   : > { %v1369_v16 = vpop.eup %1368 }
 0x337   : > { %v938_v17 = vmul.f32 %v1369_v16, %v936_v15 }
 0x339   : > { %v940_v19 = vsel %vm939_vm8, %v936_v15, %v938_v17 }
 0x33a   : > { %v943_v20 = vsel %vm941_vm10, %v942_v18, %v940_v19 }
 0x33b   : > { %v945_v21 = vsel %vm944_vm9, %v943_v20, 0.0 }
 0x33c   : > { %946 = vadd.xlane.f32.xlu1 %v945_v21 }
 0x3c9   : > { %v947_v23 = vpop.xlane.xlu1 %946 }
 0x3ca   : > { %v948_v24 = vrot.slane %v947_v23, 4 }
 0x3cc   : > { %v949_v25 = vadd.f32 %v948_v24, %v947_v23 }
 0x3ce   : > { %v950_v26 = vrot.slane %v949_v25, 2 }
 0x3d0   : > { %v951_v27 = vadd.f32 %v950_v26, %v949_v25 }
 0x3d2   : > { %v952_v28 = vrot.slane %v951_v27, 1 }
 0x3d4   : > { %v953_v29 = vadd.f32 %v952_v28, %v951_v27 }
 0x3d6   : > { %1305 = vpush %v953_v29 }
 0x407   : > { %s1306_s16 = spop %1305 }
 0x408   : > { %v955_v30 = vstv %s1306_s16 }
 0x409   : > { %957 = vst [vmem:[%s1637_s13] sm:$0xff] %v955_v30 }
 0x40a PF: > { %s1152_s29 = sshll.u32 %s1568_s28, 7  ;;  %s977_s17 = sshll.u32 %s1667_s23, 4  ;;  %s978_s17 = int_to_ptr.vmem [resolvable:$true] %s977_s17 }
 0x40b   : > { %s1795_s14 = scalar_lea.hbm %s1865_s6, %s1152_s29  ;;  %s959_s15 = scalar_lea.sflag [#allocation4], %s1631_s18 }
 0x40c   : > { %s1398_s20 = scalar_lea.vmem %s978_s17, 128  ;;  %p1881_p10 = scmp.ne.s32.totalorder %s1871_s11, 0 }
 0x40d   : > { %p1399_p9 = scmp.ne.s32.totalorder %s978_s17, %s1398_s20  ;;  %s1505_s21 = smov [#allocation5]  }
 0x40e   : > { %s1402_s19 = sshll.u32 %s1505_s21, 4  ;;  %s1403_s19 = int_to_ptr.vmem [resolvable:$false] %s1402_s19 }
 0x40f   : > { %p1400_p12 = pnand %p1399_p9, %p1881_p10  ;;  %s1404_s22 = scalar_lea.vmem %s1403_s19, 256 }
 0x410   : > { %p1405_p3 = scmp.lt.s32.totalorder %s978_s17, %s1403_s19  ;;  %p1406_p4 = scmp.lt.s32.totalorder %s1404_s22, %s1398_s20 }
 0x411   : > { %p1401_p2 = pneg %p1400_p12 }
 0x412   : > { %p1407_p7 = por %p1406_p4, %p1405_p3 }
 0x414   : > { %p1408_p8 = pnand %p1407_p7, %p1401_p2 }
 0x416   : > { %1411 = shalt.err (!%p1408_p8)
}
 0x417   : > { %s1412_s23 = scalar_lea.hbm %s1795_s14, 128  ;;  %s1416_s9 = scalar_lea.hbm %s1865_s6, 384 }
 0x418   : > { %p1413_p11 = scmp.ne.s32.totalorder %s1795_s14, %s1412_s23  ;;  %p1417_p0 = scmp.lt.u32.totalorder %s1795_s14, %s1865_s6 }
 0x419   : > { %p1418_p5 = scmp.lt.u32.totalorder %s1416_s9, %s1412_s23  ;;  %p1420_p9 = scmp.lt.u32.totalorder %s1412_s23, %s1795_s14 }
 0x41a   : > { %p1414_p13 = pnand %p1413_p11, %p1881_p10 }
 0x41b   : > { %p1419_p6 = por %p1418_p5, %p1417_p0 }
 0x41c   : > { %p1415_p1 = pneg %p1414_p13 }
 0x41d   : > { %p1421_p12 = por %p1420_p9, %p1419_p6 }
 0x41f   : > { %p1422_p2 = pnand %p1421_p12, %p1415_p1 }
 0x421   : > { %1425 = shalt.err (!%p1422_p2)
}
 0x422   : > { %1311 = dma.vmem_to_hbm [thread:$0]  (%p1881_p10), %s978_s17, 128, %s1795_s14, %s959_s15  }
 0x423   : > { %s1821_s16 = scalar_lea.hbm %s1866_s7, %s1152_s29  ;;  %s990_s8 = sshll.u32 %s1637_s13, 4  ;;  %s991_s8 = int_to_ptr.vmem [resolvable:$true] %s990_s8 }
 0x424   : > { %s964_s23 = scalar_lea.sflag [#allocation7], %s1631_s18  ;;  %s1426_s9 = scalar_lea.vmem %s991_s8, 128 }
 0x425   : > { %p1427_p3 = scmp.ne.s32.totalorder %s991_s8, %s1426_s9  ;;  %s1506_s21 = smov [#allocation6]  }
 0x426   : > { %s1430_s19 = sshll.u32 %s1506_s21, 4  ;;  %s1431_s19 = int_to_ptr.vmem [resolvable:$false] %s1430_s19 }
 0x427   : > { %p1428_p4 = pnand %p1427_p3, %p1881_p10  ;;  %s1432_s0 = scalar_lea.vmem %s1431_s19, 256 }
 0x428   : > { %p1433_p8 = scmp.lt.s32.totalorder %s991_s8, %s1431_s19  ;;  %p1434_p11 = scmp.lt.s32.totalorder %s1432_s0, %s1426_s9 }
 0x429   : > { %p1429_p7 = pneg %p1428_p4 }
 0x42a   : > { %p1435_p13 = por %p1434_p11, %p1433_p8 }
 0x42c   : > { %p1436_p1 = pnand %p1435_p13, %p1429_p7 }
 0x42e   : > { %1439 = shalt.err (!%p1436_p1)
}
 0x42f   : > { %s1440_s28 = scalar_lea.hbm %s1821_s16, 128  ;;  %s1444_s29 = scalar_lea.hbm %s1866_s7, 384 }
 0x430   : > { %p1441_p0 = scmp.ne.s32.totalorder %s1821_s16, %s1440_s28  ;;  %p1445_p9 = scmp.lt.u32.totalorder %s1821_s16, %s1866_s7 }
 0x431   : > { %p1446_p12 = scmp.lt.u32.totalorder %s1444_s29, %s1440_s28  ;;  %p1448_p3 = scmp.lt.u32.totalorder %s1440_s28, %s1821_s16 }
 0x432   : > { %p1442_p5 = pnand %p1441_p0, %p1881_p10 }
 0x433   : > { %p1447_p2 = por %p1446_p12, %p1445_p9 }
 0x434   : > { %p1443_p6 = pneg %p1442_p5 }
 0x435   : > { %p1449_p4 = por %p1448_p3, %p1447_p2 }
 0x437   : > { %p1450_p7 = pnand %p1449_p4, %p1443_p6 }
 0x439   : > { %1453 = shalt.err (!%p1450_p7)
}
 0x43a   : > { %1312 = dma.vmem_to_hbm [thread:$0]  (%p1881_p10), %s991_s8, 128, %s1821_s16, %s964_s23  }
 0x43b PF: > { %p1328_p8 = scmp.ge.s32.totalorder %s1496_s27, 2  ;;  %s1002_s0 = sand.u32 1, %s1484_s24  }
 0x43c   : > { %p1882_p11 = scmp.ne.s32.totalorder %s1872_s12, 0  ;;  %s1003_s15 = scalar_lea.sflag [#allocation4], %s1002_s0 }
 0x43e   : > { %p1320_p13 = pnand %p1328_p8, %p1882_p11 }
 0x440   : > { %1475 = dma.done.wait (!%p1320_p13), %s1003_s15, 128  }
 0x441   : > { %1477 = vsyncadd (!%p1320_p13), %s1003_s15, 4294967168  ;;  %s1012_s20 = scalar_lea.sflag [#allocation7], %s1002_s0 }
 0x442   : > { %1479 = dma.done.wait (!%p1320_p13), %s1012_s20, 128  }
 0x443   : > { %1481 = vsyncadd (!%p1320_p13), %s1012_s20, 4294967168  ;;  %p22_p10 = scmp.ge.s32.totalorder %s1572_s30, 5   ;;  %s1883_s24 = smov %s1488_s25 }
 0x444   : > { %s1884_s25 = smov %s1492_s26  ;;  %s1885_s26 = smov %s1583_s10 }
 0x445   : > { %s1886_s27 = smov %s1572_s30  ;;  %24 = sbr.rel (!%p22_p10) target bundleno = 8 (0x8), region = 108 }
 0x44c   :  { %1017 = vsyncpa [#allocation3], 1 }
 0x44d   :  { %1019 = vsyncpa [#allocation3 + $0x1], 1 }
 0x44e   :  { %1020 = vsyncpa [#allocation4], 1 }
 0x44f   :  { %1022 = vsyncpa [#allocation4 + $0x1], 1 }
 0x450   :  { %1023 = vsyncpa [#allocation7], 1 }
 0x451   :  { %1025 = vsyncpa [#allocation7 + $0x1], 1 }

</bundles_post_ra>
